<compile_context>
chip_gen: v7x
topology: tpu7x:2x2x1
jax: 0.10.0
libtpu: 0.0.40
codegen_flags: <defaults>
</compile_context>

<pallas_src>
import jax
import jax.numpy as jnp
from jax.experimental import pallas as pl
from jax.experimental.pallas import tpu as pltpu


def _round_up(x, m):
    return ((x + m - 1) // m) * m


# --------------------------------------------------------------------------- #
# Pallas kernel: per-row TransR score for one relation-homogeneous row tile.
# --------------------------------------------------------------------------- #
def _transr_score_kernel(tile_rel_ref, d_ref, r_ref, mr_ref, out_ref):
    """One grid step = one row tile that shares a single relation.

    tile_rel_ref : (num_tiles,) i32 in SMEM (scalar prefetch; used by index_maps)
    d_ref  : (tm, K)   bf16   h - t, relation-grouped & padded
    r_ref  : (tm, R)   f32    relation embedding rows
    mr_ref : (1, K, R) bf16   the single Mr matrix for this tile's relation
    out_ref: (tm, 1)   f32    per-row score ||(h - t) @ Mr + r||_2
    """
    del tile_rel_ref  # only consumed by the BlockSpec index_maps
    proj = jnp.dot(d_ref[...], mr_ref[0],
                   preferred_element_type=jnp.float32)            # (tm, R) MXU
    s = proj + r_ref[...]                                         # (tm, R) f32
    out_ref[...] = jnp.sqrt(jnp.sum(s * s, axis=-1, keepdims=True))


# --------------------------------------------------------------------------- #
# Wrapper: group-by-relation layout + pallas_call.
# --------------------------------------------------------------------------- #
def _transr_scores_grouped(d, r, rel, mr_table_bf16, *, tile_rows=128):
    """Scores for N examples: ||d_i @ Mr[rel_i] + r_i||, grouped by relation.

    d   : (N, K) bf16
    r   : (N, R) f32
    rel : (N,)   int32
    mr_table_bf16 : (n_relations, K, R) bf16
    returns (N,) f32 scores in the original order.
    """
    N, K = d.shape
    R = r.shape[-1]
    n_rel = mr_table_bf16.shape[0]

    # Row tile (multiple of 16 for bf16 sublane packing).
    tm = max(16, min(_round_up(tile_rows, 16), _round_up(N, 16)))

    # Static worst-case padded capacity: each present relation group is padded
    # to a multiple of tm.
    n_present_max = min(n_rel, N)
    P = _round_up(N + n_present_max * (tm - 1), tm)
    num_tiles = P // tm

    # Sort by relation; per-relation counts / offsets (all static shapes).
    order = jnp.argsort(rel)
    rel_sorted = rel[order]
    counts = jnp.bincount(rel, length=n_rel).astype(jnp.int32)
    padded_counts = ((counts + tm - 1) // tm) * tm
    padded_starts = (jnp.cumsum(padded_counts) - padded_counts).astype(jnp.int32)
    sorted_starts = (jnp.cumsum(counts) - counts).astype(jnp.int32)
    padded_ends = padded_starts + padded_counts

    # Destination row in the padded, relation-grouped layout for each sorted row.
    pos_in_sorted = jnp.arange(N, dtype=jnp.int32)
    dest = padded_starts[rel_sorted] + (pos_in_sorted - sorted_starts[rel_sorted])

    d_pad = jnp.zeros((P, K), d.dtype).at[dest].set(d[order])
    r_pad = jnp.zeros((P, R), r.dtype).at[dest].set(r[order])

    # One relation id per tile (tiles never straddle groups: every padded group
    # size is a multiple of tm).  Tiles past the real content are all-zero and
    # their scores are never gathered back.
    tile_starts = jnp.arange(num_tiles, dtype=jnp.int32) * tm
    tile_rel = jnp.searchsorted(padded_ends, tile_starts, side='right')
    tile_rel = jnp.clip(tile_rel, 0, n_rel - 1).astype(jnp.int32)

    scores_pad = pl.pallas_call(
        _transr_score_kernel,
        out_shape=jax.ShapeDtypeStruct((P, 1), jnp.float32),
        grid_spec=pltpu.PrefetchScalarGridSpec(
            num_scalar_prefetch=1,
            grid=(num_tiles,),
            in_specs=[
                pl.BlockSpec((tm, K), lambda i, tr: (i, 0)),
                pl.BlockSpec((tm, R), lambda i, tr: (i, 0)),
                # Data-dependent fetch of this tile's Mr from the un-gathered
                # (n_relations, K, R) table: one 16 KiB block per tile.
                pl.BlockSpec((1, K, R), lambda i, tr: (tr[i], 0, 0)),
            ],
            out_specs=pl.BlockSpec((tm, 1), lambda i, tr: (i, 0)),
        ),
        compiler_params=pltpu.CompilerParams(
            # Each tile writes its own output block -> fully parallel grid
            # (lets v7x shard the grid across both TensorCores).
            dimension_semantics=("parallel",),
        ),
    )(tile_rel, d_pad, r_pad, mr_table_bf16)

    scores_sorted = scores_pad[dest, 0]                     # (N,) sorted order
    return jnp.zeros((N,), jnp.float32).at[order].set(scores_sorted)


def transr_loss(h_pos, t_pos, r_pos, rel_pos,
                h_neg, t_neg, r_neg, rel_neg,
                mr_table, *, margin=1.0, tile_rows=128):
    """TransR hinge loss.  mr_table is (n_relations, K, R) f32 (renormed)."""
    B, K = h_pos.shape
    R = r_pos.shape[-1]

    # Single bf16 "difference" stream (one DMA stream instead of two f32 ones).
    d = jnp.concatenate([h_pos - t_pos, h_neg - t_neg], axis=0).astype(jnp.bfloat16)
    r = jnp.concatenate([r_pos, r_neg], axis=0).astype(jnp.float32)
    rel = jnp.concatenate([rel_pos, rel_neg], axis=0).astype(jnp.int32)

    scores = _transr_scores_grouped(d, r, rel, mr_table.astype(jnp.bfloat16),
                                    tile_rows=tile_rows)
    y_pos, y_neg = scores[:B], scores[B:]
    # Tiny O(B) hinge epilogue in plain JAX (scores come from the kernel).
    return jnp.sum(jnp.maximum(y_pos - y_neg + margin, 0.0))


# --------------------------------------------------------------------------- #
# Plain-JAX glue replicating nn.Embedding(max_norm=1) forward semantics.
# --------------------------------------------------------------------------- #
def maxnorm_rows(w, max_norm=1.0):
    norm = jnp.sqrt(jnp.sum(w * w, axis=-1, keepdims=True))
    scale = jnp.where(norm > max_norm, max_norm / (norm + 1e-7), 1.0)
    return w * scale


def embedding_lookup_maxnorm(table, idx, max_norm=1.0):
    return maxnorm_rows(table[idx], max_norm)


if __name__ == "__main__":
    # Small, module-consistent shapes (k_dim=128, r_dim=64 are module defaults).
    n_entities, n_relations = 32, 8
    k_dim, r_dim = 128, 64
    batch = 8
    margin = 1.0

    key = jax.random.PRNGKey(0)
    ke, kr, km, k1, k2, k3, k4, k5, k6 = jax.random.split(key, 9)

    # nn.Embedding default init is N(0, 1).
    e_w = jax.random.normal(ke, (n_entities, k_dim), jnp.float32)
    r_w = jax.random.normal(kr, (n_relations, r_dim), jnp.float32)
    mr_w = jax.random.normal(km, (n_relations, k_dim * r_dim), jnp.float32)

    # Positive / negative triples (h, r, t).
    h_pos_i = jax.random.randint(k1, (batch,), 0, n_entities)
    r_pos_i = jax.random.randint(k2, (batch,), 0, n_relations)
    t_pos_i = jax.random.randint(k3, (batch,), 0, n_entities)
    h_neg_i = jax.random.randint(k4, (batch,), 0, n_entities)
    r_neg_i = jax.random.randint(k5, (batch,), 0, n_relations)
    t_neg_i = jax.random.randint(k6, (batch,), 0, n_entities)

    # max_norm renorm of the Mr table (flat rows, as nn.Embedding does), then
    # reshape to (n_relations, K, R).  Rows not looked up don't affect output.
    mr_table = maxnorm_rows(mr_w).reshape(n_relations, k_dim, r_dim)

    hp = embedding_lookup_maxnorm(e_w, h_pos_i)
    tp = embedding_lookup_maxnorm(e_w, t_pos_i)
    rp = embedding_lookup_maxnorm(r_w, r_pos_i)
    hn = embedding_lookup_maxnorm(e_w, h_neg_i)
    tn = embedding_lookup_maxnorm(e_w, t_neg_i)
    rn = embedding_lookup_maxnorm(r_w, r_neg_i)

    loss = transr_loss(hp, tp, rp, r_pos_i, hn, tn, rn, r_neg_i,
                       mr_table, margin=margin)
    loss = jax.block_until_ready(loss)

    # Pure-JAX f32 reference of the PyTorch forward.
    def ref_predict(h, t, r, rel_i):
        mr = mr_table[rel_i]                                       # (B, K, R)
        s = (jnp.einsum('bk,bkr->br', h, mr) + r
             - jnp.einsum('bk,bkr->br', t, mr))
        return jnp.sqrt(jnp.sum(s ** 2, axis=1))

    y_pos = ref_predict(hp, tp, rp, r_pos_i)
    y_neg = ref_predict(hn, tn, rn, r_neg_i)
    ref = jnp.sum(jnp.maximum(y_pos - y_neg + margin, 0.0))

    # bf16 Mr / (h - t) inside the kernel matmul -> slightly looser tolerance.
    assert jnp.allclose(loss, ref, rtol=2e-2, atol=2e-2), (loss, ref)
    print("KERNEL_OK")
</pallas_src>

<mosaic_0001>
module attributes {stable_mosaic.version = 11 : i64} {
  func.func @_transr_score_kernel(%arg0: i32, %arg1: memref<9xi32, #tpu.memory_space<smem>>, %arg2: memref<16x128xbf16, #tpu.memory_space<vmem>>, %arg3: memref<16x64xf32, #tpu.memory_space<vmem>>, %arg4: memref<1x128x64xbf16, #tpu.memory_space<vmem>>, %arg5: memref<16x1xf32, #tpu.memory_space<vmem>>) attributes {dimension_semantics = [#tpu.dimension_semantics<parallel>], iteration_bounds = array<i64: 9>, scalar_prefetch = 1 : i64, scratch_operands = 0 : i64, tpu.core_type = #tpu.core_type<tc>, window_params = [{transform_indices = @transform_0, window_bounds = array<i64: 16, 128>}, {transform_indices = @transform_1, window_bounds = array<i64: 16, 64>}, {transform_indices = @transform_2, window_bounds = array<i64: 1, 128, 64>}, {transform_indices = @transform_3, window_bounds = array<i64: 16, 1>}]} {
    %c0 = arith.constant 0 : index
    %c0_0 = arith.constant 0 : index
    %0 = vector.load %arg2[%c0, %c0_0] : memref<16x128xbf16, #tpu.memory_space<vmem>>, vector<16x128xbf16>
    %c0_1 = arith.constant 0 : index
    %c0_2 = arith.constant 0 : index
    %c0_3 = arith.constant 0 : index
    %1 = vector.load %arg4[%c0_1, %c0_2, %c0_3] : memref<1x128x64xbf16, #tpu.memory_space<vmem>>, vector<1x128x64xbf16>
    %2 = vector.shape_cast %1 : vector<1x128x64xbf16> to vector<128x64xbf16>
    %cst = arith.constant dense<0.000000e+00> : vector<16x64xf32>
    %3 = tpu.matmul %0, %2, %cst {dimension_numbers = #tpu.dot_dimension_numbers<[1], [0], [0], [1], [0, 0, 1, 1], [], []>} : vector<16x128xbf16>, vector<128x64xbf16>, vector<16x64xf32> -> vector<16x64xf32>
    %c0_4 = arith.constant 0 : index
    %c0_5 = arith.constant 0 : index
    %4 = vector.load %arg3[%c0_4, %c0_5] : memref<16x64xf32, #tpu.memory_space<vmem>>, vector<16x64xf32>
    %5 = arith.addf %3, %4 : vector<16x64xf32>
    %6 = arith.mulf %5, %5 : vector<16x64xf32>
    %cst_6 = arith.constant dense<0.000000e+00> : vector<16xf32>
    %7 = vector.multi_reduction <add>, %6, %cst_6 [1] : vector<16x64xf32> to vector<16xf32>
    %8 = vector.shape_cast %7 : vector<16xf32> to vector<16x1xf32>
    %9 = math.sqrt %8 : vector<16x1xf32>
    %c0_7 = arith.constant 0 : index
    %c0_8 = arith.constant 0 : index
    %10 = vector.load %arg5[%c0_7, %c0_8] : memref<16x1xf32, #tpu.memory_space<vmem>>, vector<16x1xf32>
    tpu.vector_store %arg5[%c0_7, %c0_8], %9 {strides = array<i32>} : memref<16x1xf32, #tpu.memory_space<vmem>>, vector<16x1xf32>,
    return
  }
  func.func @transform_0(%arg0: i32, %arg1: memref<9xi32, #tpu.memory_space<smem>>) -> (i32, i32) {
    %c0_i32 = arith.constant 0 : i32
    %c0_i32_0 = arith.constant 0 : i32
    return %arg0, %c0_i32 : i32, i32
  }
  func.func @transform_1(%arg0: i32, %arg1: memref<9xi32, #tpu.memory_space<smem>>) -> (i32, i32) {
    %c0_i32 = arith.constant 0 : i32
    %c0_i32_0 = arith.constant 0 : i32
    return %arg0, %c0_i32 : i32, i32
  }
  func.func @transform_2(%arg0: i32, %arg1: memref<9xi32, #tpu.memory_space<smem>>) -> (i32, i32, i32) {
    %0 = arith.index_cast %arg0 : i32 to index
    %1 = memref.load %arg1[%0] : memref<9xi32, #tpu.memory_space<smem>>
    %c0_i32 = arith.constant 0 : i32
    %c0_i32_0 = arith.constant 0 : i32
    %c0_i32_1 = arith.constant 0 : i32
    return %1, %c0_i32, %c0_i32_0 : i32, i32, i32
  }
  func.func @transform_3(%arg0: i32, %arg1: memref<9xi32, #tpu.memory_space<smem>>) -> (i32, i32) {
    %c0_i32 = arith.constant 0 : i32
    %c0_i32_0 = arith.constant 0 : i32
    return %arg0, %c0_i32 : i32, i32
  }
}

</mosaic_0001>

<bundles_post_ra>
// kernel: tpu_custom_call.1
= control target key start
LH: loop header
LB: loop body
LE: loop exit
PB: predicated region body
PF: predicated region fallthrough
CT: control target
= control target key end

     0   :  { %s610_s0 = inlined_call_operand.vmem [shape: s32[9], index: 0, kind: input, shape index: {}]   ;;  %s611_s1 = inlined_call_operand.vmem [shape: bf16[144,128], index: 1, kind: input, shape index: {}]   ;;  %s612_s2 = inlined_call_operand.vmem [shape: f32[144,64], index: 2, kind: input, shape index: {}]   ;;  %s613_s3 = inlined_call_operand.vmem [shape: bf16[8,128,64], index: 3, kind: input, shape index: {}]   ;;  %s614_s4 = inlined_call_operand.vmem [shape: f32[144,1], index: 4, kind: output, shape index: {}]  }
   0x1   :  { %s9_s17 = sshll.u32 %s610_s0, 4  ;;  %s10_s17 = int_to_ptr.vmem [resolvable:$true] %s9_s17 }
   0x2   :  { %s530_s18 = scalar_lea.vmem %s10_s17, 16  ;;  %p535_p1 = scmp.lt.s32.totalorder %s10_s17, %s10_s17 }
   0x3   :  { %p531_p0 = scmp.ne.s32.totalorder %s10_s17, %s530_s18  ;;  %p536_p2 = scmp.lt.s32.totalorder %s530_s18, %s530_s18 }
   0x5   :  { %p537_p3 = por %p536_p2, %p535_p1 }
   0x7   :  { %p538_p4 = pnand %p537_p3, %p531_p0 }
   0x9   :  { %541 = shalt.err (!%p538_p4)  }
   0xa   :  { %s552_s19 = smov [#allocation3]  }
   0xb   :  { %12 = dma.vmem_to_smem %s10_s17, 16, %s552_s19, [#allocation2] }
   0xc   :  { %546 = dma.done.wait [#allocation2], 16 }
   0xd   :  { %547 = vsyncadd [#allocation2], 4294967280 }
   0xe   :  { %14 = sfence }
   0xf   :  { %s583_s20 = smov 0  }
  0x10 LB: > { %s452_s0 = sadd.s32 4294967295, %s550_s20   ;;  %p456_p5 = scmp.ge.s32.totalorder %s550_s20, 1  ;;  %s550_s20 = sphi %s583_s20, %s20_s20  }
  0x11   : > { %p170_p6 = scmp.lt.s32.totalorder %s550_s20, 10 }
  0x13   : > { %p171_p7 = pnand %p456_p5, %p170_p6 }
  0x14   : > { %s217_s21 = sld [smem:[#allocation3 + %s452_s0]] (!%p171_p7)  ;;  %s457_s22 = sshll.u32 (!%p171_p7), %s452_s0, 1  ;;  %v553_v0 = vmov (!%p171_p7), 0.0   ;;  %vm554_vm0 = vmmov (!%p171_p7), 0   ;;  %vm348_vm1 = vcmask (!%p171_p7), 523264   ;;  %vm369_vm3 = vcmask (!%p171_p7), 7168  }
  0x15   : > { %174 = sbr.rel (%p171_p7) target bundleno = 442 (0x1ba), region = 32  ;;  %486 = vmatprep.subr.bf16.mxu0 (!%p171_p7), %v553_v0  ;;  %502 = vmatprep.mubr.msk.bf16.mxu0 (!%p171_p7), %vm554_vm0, %v553_v0  ;;  %p206_p8 = scmp.lt.s32.totalorder (!%p171_p7), %s457_s22, 17 }
  0x1a   : > { %p218_p9 = scmp.lt.s32.totalorder (!%p171_p7), %s217_s21, 7 }
  0x1c   : > { %s616_s22 = smov (!%p206_p8, %s457_s22), 17  ;;  %s618_s21 = smov (!%p218_p9, %s217_s21), 7 }
  0x1d   : > { %s458_s23 = sshll.u32 %s616_s22, 2  ;;  %s476_s27 = sshll.u32 %s618_s21, 6 }
  0x1e   : > { %s209_s26 = scalar_lea.vmem %s611_s1, %s458_s23  ;;  %s222_s30 = scalar_lea.vmem %s613_s3, %s476_s27 }
  0x1f   : > { %v517_v1 = vld [vmem:[%s222_s30] sm:$0xff]   ;;  %v518_v2 = vld [vmem:[%s222_s30 + $0x8] sm:$0xff]   ;;  %v519_v3 = vld [vmem:[%s222_s30 + $0x10] sm:$0xff]   ;;  %s460_s5 = sshll.u32 %s616_s22, 3 }
  0x20   : > { %487 = vmatpush3.bf16.msra.mxu0 %v517_v1  ;;  %v520_v4 = vld [vmem:[%s222_s30 + $0x18] sm:$0xff]   ;;  %v521_v5 = vld [vmem:[%s222_s30 + $0x20] sm:$0xff]   ;;  %v522_v6 = vld [vmem:[%s222_s30 + $0x28] sm:$0xff]   ;;  %s215_s8 = scalar_lea.vmem %s612_s2, %s460_s5  ;;  %s228_s11 = scalar_lea.vmem %s614_s4, %s460_s5 }
  0x21   : > { %488 = vmatprep.subr.bf16.mxu0 %v553_v0  ;;  %v523_v7 = vld [vmem:[%s222_s30 + $0x30] sm:$0xff]   ;;  %v524_v8 = vld [vmem:[%s222_s30 + $0x38] sm:$0xff]   ;;  %v525_v9 = vld [vmem:[%s209_s26] sm:$0xff]  }
  0x22   : > { %v249_v10 = vld [vmem:[%s215_s8] sm:$0xff]  ;;  %v250_v12 = vld [vmem:[%s215_s8 + $0x8] sm:$0xff] }
  0x24   : > { %489 = vmatpush3.bf16.msra.mxu0 %v518_v2 }
  0x25   : > { %490 = vmatprep.subr.bf16.mxu0 %v553_v0 }
  0x28   : > { %491 = vmatpush3.bf16.msra.mxu0 %v519_v3 }
  0x29   : > { %492 = vmatprep.subr.bf16.mxu0 %v553_v0 }
  0x2c   : > { %493 = vmatpush3.bf16.msra.mxu0 %v520_v4 }
  0x2d   : > { %494 = vmatprep.subr.bf16.mxu0 %v553_v0 }
  0x30   : > { %495 = vmatpush3.bf16.msra.mxu0 %v521_v5 }
  0x31   : > { %496 = vmatprep.subr.bf16.mxu0 %v553_v0 }
  0x34   : > { %497 = vmatpush3.bf16.msra.mxu0 %v522_v6 }
  0x35   : > { %498 = vmatprep.subr.bf16.mxu0 %v553_v0 }
  0x38   : > { %499 = vmatpush3.bf16.msra.mxu0 %v523_v7 }
  0x39   : > { %500 = vmatprep.subr.bf16.mxu0 %v553_v0 }
  0x3c   : > { %501 = vmatpush3.bf16.msra.mxu0 %v524_v8 }
  0x3f   : > { %503 = vmatmul.mubr.bf16.vlgmr.msra.gmra.mrb[0].mxu0 %v525_v9 }
 0x112   : > { %v339_v11 = vpop.f32.mrb[0].mxu0 }
 0x113   : > { %v340_v13 = vadd.f32 %v339_v11, %v249_v10  ;;  %v504_v14 = vpop.f32.mrb[1].mxu0 }
 0x114   : > { %v342_v15 = vpop.f32.mrb[2].mxu0 }
 0x115   : > { %v346_v16 = vmul.f32 %v340_v13, %v340_v13  ;;  %v343_v17 = vadd.f32 %v342_v15, %v250_v12  ;;  %v505_v18 = vpop.f32.mrb[3].mxu0 }
 0x117   : > { %v347_v19 = vmul.f32 %v343_v17, %v343_v17  ;;  %v349_v20 = vsel %vm348_vm1, %v346_v16, 0.0 }
 0x118   : > { %350 = vadd.xlane.f32.xlu0 %v349_v20 }
 0x119   : > { %v352_v21 = vsel %vm348_vm1, %v347_v19, 0.0 }
 0x11c   : > { %353 = vadd.xlane.f32.xlu0 %v352_v21 }
 0x1a5   : > { %v351_v22 = vpop.xlane.xlu0 %350 }
 0x1a6   : > { %526 = vrsqrt.f32 %v351_v22  ;;  %vm357_vm2 = vcmp.eq.f32.partialorder %v351_v22, inf  ;;  %v360_v26 = vand.u32 2147483648, %v351_v22  ;;  %vm359_vm4 = vcmp.eq.f32.partialorder %v351_v22, 0.0 }
 0x1a9   : > { %v354_v23 = vpop.xlane.xlu0 %353 }
 0x1aa   : > { %528 = vrsqrt.f32 %v354_v23  ;;  %vm364_vm5 = vcmp.eq.f32.partialorder %v354_v23, inf  ;;  %v367_v31 = vand.u32 2147483648, %v354_v23  ;;  %vm366_vm6 = vcmp.eq.f32.partialorder %v354_v23, 0.0 }
 0x1b0   : > { %v527_v24 = vpop.eup %526 }
 0x1b1   : > { %v356_v25 = vmul.f32 %v527_v24, %v351_v22 }
 0x1b3   : > { %v358_v27 = vsel %vm357_vm2, %v351_v22, %v356_v25 }
 0x1b4   : > { %v529_v28 = vpop.eup %528  ;;  %v361_v29 = vsel %vm359_vm4, %v360_v26, %v358_v27 }
 0x1b5   : > { %370 = vst.msk [vmem:[%s228_s11] sm:$0xff] %vm369_vm3, %v361_v29  ;;  %v363_v30 = vmul.f32 %v529_v28, %v354_v23 }
 0x1b7   : > { %v365_v32 = vsel %vm364_vm5, %v354_v23, %v363_v30 }
 0x1b8   : > { %v368_v33 = vsel %vm366_vm6, %v367_v31, %v365_v32 }
 0x1b9   : > { %371 = vst.msk [vmem:[%s228_s11 + $0x8] sm:$0xff] %vm369_vm3, %v368_v33 }
 0x1ba PF: > { %s20_s20 = sadd.s32 1, %s550_s20  }
 0x1bb   : > { %p17_p10 = scmp.ge.s32.totalorder %s20_s20, 11  }
 0x1bd   :  { %19 = sbr.rel (!%p17_p10) target bundleno = 16 (0x10), region = 68 }

</bundles_post_ra>
